<compile_context>
chip_gen: v6e
topology: v6e:2x2x1
jax: 0.10.0
libtpu: 0.0.40
codegen_flags: <defaults>
</compile_context>

<pallas_src>
import jax
import jax.numpy as jnp
from jax.experimental import pallas as pl
from jax.experimental.pallas import tpu as pltpu

_LANE = 128


def _round_up(x, m):
    return (x + m - 1) // m * m


def _cdiv(a, b):
    return -(-a // b)


def _vmem_budget_bytes():
    """~75% of this chip's per-core VMEM; conservative 48 MiB fallback (v7x)."""
    cap = 64 << 20
    try:
        cap = int(getattr(pltpu.get_tpu_info(), "vmem_capacity_bytes", cap)) or cap
    except Exception:
        cap = 64 << 20
    return (cap * 3) // 4


_SINGLE_BUFFER_OK = None


def _single_buffer_supported():
    """One-time probe: does this build accept pipeline_mode=pl.Buffered(1)?"""
    global _SINGLE_BUFFER_OK
    if _SINGLE_BUFFER_OK is not None:
        return _SINGLE_BUFFER_OK

    def _probe_kernel(a_ref, w_ref, o_ref):
        o_ref[...] = a_ref[...] + w_ref[...]

    try:
        with jax.ensure_compile_time_eval():   # execute for real even under a jit trace
            probe = pl.pallas_call(
                _probe_kernel,
                out_shape=jax.ShapeDtypeStruct((16, _LANE), jnp.float32),
                grid_spec=pltpu.PrefetchScalarGridSpec(
                    num_scalar_prefetch=0,
                    grid=(2, 1),
                    in_specs=[
                        pl.BlockSpec((8, _LANE), lambda i, j: (i, 0)),
                        pl.BlockSpec((8, _LANE), lambda i, j: (0, 0),
                                     pipeline_mode=pl.Buffered(1)),
                    ],
                    out_specs=pl.BlockSpec((8, _LANE), lambda i, j: (i, 0)),
                ),
                compiler_params=pltpu.CompilerParams(
                    dimension_semantics=("parallel", "parallel")),
            )
            jax.block_until_ready(
                probe(jnp.zeros((16, _LANE), jnp.float32),
                      jnp.zeros((8, _LANE), jnp.float32)))
        _SINGLE_BUFFER_OK = True
    except Exception:
        _SINGLE_BUFFER_OK = False
    return _SINGLE_BUFFER_OK


def _patch_embed_kernel(patches_ref, w_ref, b_ref, o_ref):
    # patches_ref: (TM, Kp); w_ref: (Kp, TN); b_ref: (1, TN); o_ref: (TM, TN)
    acc = jnp.dot(patches_ref[...], w_ref[...],
                  preferred_element_type=jnp.float32)
    o_ref[...] = (acc + b_ref[...]).astype(o_ref.dtype)


def patch_embed(x, weight, bias, patch_size, *,
                compute_dtype=jnp.bfloat16, tm_cap=2048):
    """ViT patch embedding.

    x: (B, C, H, W) NCHW.  weight: (E, C, p, p) (Conv2d OIHW).  bias: (E,).
    Returns (B, n_patches, E) in x.dtype.  The matmul accumulates in f32; with
    the default bf16 operands expect ~1e-2 relative error vs. an f32 reference
    (use compute_dtype=jnp.float32 for the exact path).
    """
    B, C, H, W = x.shape
    E = weight.shape[0]
    p = patch_size
    nh, nw = H // p, W // p
    n_patches = nh * nw
    K = C * p * p
    M = B * n_patches
    out_dtype = x.dtype

    # --- im2col + cast: layout-only glue.  With allow_input_fusion below, XLA
    # may fold this producer chain into the kernel's input DMA under jit, so
    # the patches matrix is not materialized in HBM. ---
    xp = x.reshape(B, C, nh, p, nw, p).transpose(0, 2, 4, 1, 3, 5)
    patches = xp.reshape(M, K)
    w_mat = weight.reshape(E, K).T                       # (K, E), Conv2d OIHW order

    if compute_dtype is not None:
        patches = patches.astype(compute_dtype)
        w_mat = w_mat.astype(compute_dtype)
    in_it = jnp.dtype(patches.dtype).itemsize
    out_it = jnp.dtype(out_dtype).itemsize
    sub = 16 if min(in_it, out_it) < 4 else 8            # sublane multiple

    # --- pad both MXU dims to lane multiples (zero pads -> exact). ---
    Kp = _round_up(K, _LANE)
    Ep = _round_up(E, _LANE)

    budget = _vmem_budget_bytes()

    # --- embed-dim tiling: keep the whole weight resident when it fits half the
    # budget, otherwise stream (Kp, TN) weight tiles over a second grid axis
    # rather than shrinking the row tile. ---
    if Kp * Ep * in_it + Ep * 4 <= budget // 2:
        TN = Ep
    else:
        TN = max(_LANE, ((budget // 3) // (2 * Kp * in_it)) // _LANE * _LANE)
        Ep = _round_up(Ep, TN)
    n_n = Ep // TN
    single_buf = (n_n == 1) and _single_buffer_supported()
    w_bufs = 1 if single_buf else 2

    if Kp != K:
        patches = jnp.pad(patches, ((0, 0), (0, Kp - K)))
    if Kp != K or Ep != E:
        w_mat = jnp.pad(w_mat, ((0, Kp - K), (0, Ep - E)))
    if Ep != E:
        bias = jnp.pad(bias, (0, Ep - E))
    b_mat = bias.reshape(1, Ep).astype(jnp.float32)

    # --- row tile: as big as the remaining VMEM allows (double-buffered patch
    # and output tiles), capped at tm_cap, split so v7x gets >= 2 tiles. ---
    resident = w_bufs * (Kp * TN * in_it + TN * 4)
    per_row = 2 * Kp * in_it + 2 * TN * out_it
    tm_fit = max(sub, (max(budget - resident, 0) // per_row) // sub * sub)
    TM = max(sub, min(tm_cap, tm_fit, _round_up(M, sub)))
    if M > sub:
        TM = min(TM, _round_up(_cdiv(M, 2), sub))        # >= 2 row tiles (megacore)
    Mp = _round_up(M, TM)
    if Mp != M:
        patches = jnp.pad(patches, ((0, Mp - M), (0, 0)))
    grid = (Mp // TM, n_n)

    need = resident + TM * per_row
    vmem_limit = int(max(budget, need + (2 << 20)))      # never below requirement

    cost = pl.CostEstimate(
        flops=2 * Mp * Kp * Ep,
        transcendentals=0,
        bytes_accessed=(Mp * Kp * in_it + Kp * Ep * in_it + Ep * 4
                        + Mp * Ep * out_it),
    )

    if single_buf:
        w_spec = pl.BlockSpec((Kp, TN), lambda i, j: (0, j),
                              pipeline_mode=pl.Buffered(1))
        b_spec = pl.BlockSpec((1, TN), lambda i, j: (0, j),
                              pipeline_mode=pl.Buffered(1))
    else:
        w_spec = pl.BlockSpec((Kp, TN), lambda i, j: (0, j))
        b_spec = pl.BlockSpec((1, TN), lambda i, j: (0, j))

    out = pl.pallas_call(
        _patch_embed_kernel,
        out_shape=jax.ShapeDtypeStruct((Mp, Ep), out_dtype),
        grid_spec=pltpu.PrefetchScalarGridSpec(
            num_scalar_prefetch=0,
            grid=grid,
            in_specs=[
                # Patch rows: constant in j (fastest grid axis), so each row
                # tile is fetched once even when the embed dim is tiled.
                pl.BlockSpec((TM, Kp), lambda i, j: (i, 0)),
                w_spec,
                b_spec,
            ],
            out_specs=pl.BlockSpec((TM, TN), lambda i, j: (i, j)),
        ),
        compiler_params=pltpu.CompilerParams(
            dimension_semantics=("parallel", "parallel"),
            vmem_limit_bytes=vmem_limit,
            allow_input_fusion=[True, True, True],
        ),
        cost_estimate=cost,
    )(patches, w_mat, b_mat)

    if Mp == M and Ep == E:                              # no padding -> no extra copy
        return out.reshape(B, n_patches, E)
    return out[:M, :E].reshape(B, n_patches, E)


if __name__ == "__main__":
    # Small shapes consistent with the module: img_size=16, patch_size=4,
    # in_chans=4, embed_dim=32, batch=2 -> n_patches = (16//4)^2 = 16.
    B, C, IMG, P, E = 2, 4, 16, 4, 32

    key = jax.random.PRNGKey(0)
    kx, kw, kb = jax.random.split(key, 3)

    x = jax.random.normal(kx, (B, C, IMG, IMG), dtype=jnp.float32)
    fan_in = C * P * P
    bound = 1.0 / (fan_in ** 0.5)
    weight = jax.random.uniform(kw, (E, C, P, P), jnp.float32, -bound, bound)
    bias = jax.random.uniform(kb, (E,), jnp.float32, -bound, bound)

    # Reference: Conv2d(kernel=stride=P) -> flatten(2) -> transpose(1, 2).
    ref = jax.lax.conv_general_dilated(
        x, weight, window_strides=(P, P), padding="VALID",
        dimension_numbers=("NCHW", "OIHW", "NCHW"))
    ref = (ref + bias[None, :, None, None]).reshape(B, E, -1).transpose(0, 2, 1)

    # Exact path (f32 operands) -- tight tolerance.
    fwd_f32 = jax.jit(lambda a, w, b: patch_embed(a, w, b, P,
                                                  compute_dtype=jnp.float32))
    out_f32 = jax.block_until_ready(fwd_f32(x, weight, bias))
    assert out_f32.shape == (B, (IMG // P) ** 2, E)
    assert jnp.allclose(out_f32, ref, atol=1e-5, rtol=1e-5)

    # Default path (bf16 operands, f32 accumulation) -- loose tolerance.
    fwd = jax.jit(lambda a, w, b: patch_embed(a, w, b, P))
    out_bf16 = jax.block_until_ready(fwd(x, weight, bias))
    assert out_bf16.shape == (B, (IMG // P) ** 2, E)
    assert jnp.allclose(out_bf16, ref, atol=1e-1, rtol=1e-1)

    print("KERNEL_OK")
</pallas_src>

<mosaic_0001>
module attributes {stable_mosaic.version = 11 : i64} {
  func.func @_patch_embed_kernel(%arg0: i32, %arg1: i32, %arg2: memref<16x128xf32, #tpu.memory_space<vmem>>, %arg3: memref<128x128xf32, #tpu.memory_space<vmem>>, %arg4: memref<1x128xf32, #tpu.memory_space<vmem>>, %arg5: memref<16x128xf32, #tpu.memory_space<vmem>>) attributes {dimension_semantics = [#tpu.dimension_semantics<parallel>, #tpu.dimension_semantics<parallel>], iteration_bounds = array<i64: 2, 1>, scalar_prefetch = 0 : i64, scratch_operands = 0 : i64, tpu.core_type = #tpu.core_type<tc>, window_params = [{transform_indices = @transform_0, window_bounds = array<i64: 16, 128>}, {transform_indices = @transform_1, window_bounds = array<i64: 128, 128>}, {transform_indices = @transform_2, window_bounds = array<i64: 1, 128>}, {transform_indices = @transform_3, window_bounds = array<i64: 16, 128>}]} {
    %c0 = arith.constant 0 : index
    %c0_0 = arith.constant 0 : index
    %0 = vector.load %arg2[%c0, %c0_0] : memref<16x128xf32, #tpu.memory_space<vmem>>, vector<16x128xf32>
    %c0_1 = arith.constant 0 : index
    %c0_2 = arith.constant 0 : index
    %1 = vector.load %arg3[%c0_1, %c0_2] : memref<128x128xf32, #tpu.memory_space<vmem>>, vector<128x128xf32>
    %cst = arith.constant dense<0.000000e+00> : vector<16x128xf32>
    %2 = tpu.matmul %0, %1, %cst {dimension_numbers = #tpu.dot_dimension_numbers<[1], [0], [0], [1], [0, 0, 1, 1], [], []>} : vector<16x128xf32>, vector<128x128xf32>, vector<16x128xf32> -> vector<16x128xf32>
    %c0_3 = arith.constant 0 : index
    %c0_4 = arith.constant 0 : index
    %3 = vector.load %arg4[%c0_3, %c0_4] : memref<1x128xf32, #tpu.memory_space<vmem>>, vector<1x128xf32>
    %4 = vector.broadcast %3 : vector<1x128xf32> to vector<16x128xf32>
    %5 = arith.addf %2, %4 : vector<16x128xf32>
    %c0_5 = arith.constant 0 : index
    %c0_6 = arith.constant 0 : index
    %6 = vector.load %arg5[%c0_5, %c0_6] : memref<16x128xf32, #tpu.memory_space<vmem>>, vector<16x128xf32>
    tpu.vector_store %arg5[%c0_5, %c0_6], %5 {strides = array<i32>} : memref<16x128xf32, #tpu.memory_space<vmem>>, vector<16x128xf32>,
    return
  }
  func.func @transform_0(%arg0: i32, %arg1: i32) -> (i32, i32) {
    %c0_i32 = arith.constant 0 : i32
    %c0_i32_0 = arith.constant 0 : i32
    return %arg0, %c0_i32 : i32, i32
  }
  func.func @transform_1(%arg0: i32, %arg1: i32) -> (i32, i32) {
    %c0_i32 = arith.constant 0 : i32
    %c0_i32_0 = arith.constant 0 : i32
    return %c0_i32, %arg1 : i32, i32
  }
  func.func @transform_2(%arg0: i32, %arg1: i32) -> (i32, i32) {
    %c0_i32 = arith.constant 0 : i32
    %c0_i32_0 = arith.constant 0 : i32
    return %c0_i32, %arg1 : i32, i32
  }
  func.func @transform_3(%arg0: i32, %arg1: i32) -> (i32, i32) {
    %c0_i32 = arith.constant 0 : i32
    return %arg0, %arg1 : i32, i32
  }
}

</mosaic_0001>

<bundles_post_ra>
// kernel: _lambda_.2
= control target key start
LH: loop header
LB: loop body
LE: loop exit
PB: predicated region body
PF: predicated region fallthrough
CT: control target
= control target key end

     0   :  { %s1079_s0 = inlined_call_operand.vmem [shape: f32[64,32], index: 0, kind: input, shape index: {}]   ;;  %s1080_s1 = inlined_call_operand.<no memory space> [shape: f32[], index: 1, kind: input, shape index: {}]   ;;  %s1081_s2 = inlined_call_operand.vmem [shape: f32[32,64], index: 2, kind: input, shape index: {}]   ;;  %s1082_s3 = inlined_call_operand.vmem [shape: f32[32], index: 3, kind: input, shape index: {}]   ;;  %s1083_s4 = inlined_call_operand.hbm [shape: f32[32,128], index: 4, kind: output, shape index: {}]  }
   0x1   :  { %v896_v0 = vstv %s1080_s1 }
   0x2   :  { %12 = vsyncpa [#allocation18], 0 }
   0x3   :  { %14 = vsyncpa [#allocation18 + $0x1], 0  ;;  %s898_s17 = smov 0   ;;  %s900_s18 = smov 0  }
   0x4   :  { %s902_s19 = smov 0   ;;  %s904_s20 = smov 0  }
   0x5   :  { %s906_s21 = smov 0   ;;  %s908_s22 = smov 0  }
   0x6 LB: > { %s653_s1 = sadd.s32 4294967295, %s863_s22   ;;  %s654_s23 = sadd.s32 4294967294, %s863_s22   ;;  %s863_s22 = sphi %s908_s22, %s20_s22   ;;  %s859_s21 = sphi %s906_s21, %s1090_s21   ;;  %s855_s20 = sphi %s904_s20, %s1089_s20   ;;  %s851_s19 = sphi %s902_s19, %s1088_s19   ;;  %s847_s18 = sphi %s900_s18, %s1087_s18   ;;  %s843_s17 = sphi %s898_s17, %s1086_s17  }
   0x7   : > { %s32_s24 = sadd.s32 1, %s859_s21  ;;  %s114_s25 = sadd.s32 1, %s851_s19 }
   0x8   : > { %p34_p0 = scmp.ge.s32.totalorder %s32_s24, 2  ;;  %p124_p1 = scmp.ne.s32.totalorder %s851_s19, %s847_s18 }
   0x9   : > { %p125_p2 = scmp.eq.s32.totalorder %s653_s1, 1  ;;  %p130_p3 = scmp.ne.s32.totalorder %s847_s18, %s843_s17 }
   0xa   : > { %s1092_s24 = smov (%p34_p0, %s32_s24), 0  ;;  %p131_p5 = scmp.eq.s32.totalorder %s654_s23, 1 }
   0xb   : > { %p938_p4 = por %p125_p2, %p124_p1  ;;  %s109_s27 = ssub.s32 %s859_s21, %s1092_s24 }
   0xc   : > { %p658_p6 = scmp.ge.s32.totalorder %s863_s22, 1  ;;  %p112_p7 = scmp.eq.s32.totalorder %s109_s27, 0 }
   0xd   : > { %p945_p8 = por %p131_p5, %p130_p3  ;;  %p172_p9 = scmp.lt.s32.totalorder %s863_s22, 3 }
   0xe   : > { %s951_s29 = scalar_select %p112_p7, %s851_s19, %s114_s25  }
   0xf   : > { %p173_p10 = pnand %p658_p6, %p172_p9 }
  0x11   : > { %176 = sbr.rel (%p173_p10) target bundleno = 265 (0x109), region = 32 }
  0x16   : > { %695 = vmatprep.subr.mxu0 %v896_v0  ;;  %v218_v1 = vlaneseq  ;;  %v441_v2 = vld [vmem:[%s1082_s3] sm:$0x1]  ;;  %s660_s6 = sshll.u32 %s855_s20, 1  ;;  %v669_v7 = vld [vmem:[%s1079_s0 + $0x38] sm:$0xff]  ;;  %v668_v8 = vld [vmem:[%s1079_s0 + $0x30] sm:$0xff]  ;;  %s199_s11 = sand.u32 1, %s847_s18  }
  0x17   : > { %696 = vmatpush3.msra.mxu0 %v896_v0  ;;  %p203_p11 = scmp.lt.s32.totalorder %s660_s6, 3  ;;  %v667_v10 = vld [vmem:[%s1079_s0 + $0x28] sm:$0xff]  ;;  %v666_v12 = vld [vmem:[%s1079_s0 + $0x20] sm:$0xff]  ;;  %v665_v14 = vld [vmem:[%s1079_s0 + $0x18] sm:$0xff]  ;;  %s659_s12 = sshll.u32 %s199_s11, 4 }
  0x18   : > { %697 = vmatprep.subr.mxu0 %v896_v0  ;;  %vm444_vm0 = vcmp.lt.s32.totalorder %v218_v1, 32  ;;  %v219_v3 = vand.u32 127, %v218_v1  ;;  %v664_v16 = vld [vmem:[%s1079_s0 + $0x10] sm:$0xff]  ;;  %v663_v18 = vld [vmem:[%s1079_s0 + $0x8] sm:$0xff]  ;;  %v241_v20 = vld [vmem:[%s1079_s0] sm:$0xff]  ;;  %s201_s13 = scalar_lea.vmem [#allocation17], %s659_s12 }
  0x19   : > { %698 = vmatpush3.msra.mxu0 %v896_v0  ;;  %v445_v4 = vsel %vm444_vm0, %v441_v2, %v896_v0  ;;  %s1094_s6 = smov (!%p203_p11, %s660_s6), 3  ;;  %s566_s14 = sshll.u32 %s201_s13, 4  ;;  %s1027_s14 = int_to_ptr.vmem [resolvable:$true] %s566_s14 }
  0x1a   : > { %699 = vmatprep.subr.mxu0 %v896_v0  ;;  %448 = vst [vmem:[#allocation21] sm:$0x1] %v445_v4  ;;  %s661_s7 = sshll.u32 %s1094_s6, 3  ;;  %vm221_vm1 = vcmp.lt.s32.totalorder %v219_v3, 64  ;;  %vm252_vm2 = vcmp.lt.s32.totalorder %v219_v3, 32  ;;  %s676_s15 = sshll.u32 %s855_s20, 8 }
  0x1b   : > { %700 = vmatpush3.msra.mxu0 %v896_v0  ;;  %s968_s10 = scalar_lea.vmem %s1081_s2, %s661_s7  ;;  %v404_v9 = vsel %vm252_vm2, %v669_v7, %v896_v0  ;;  %v384_v11 = vsel %vm252_vm2, %v668_v8, %v896_v0  ;;  %v362_v13 = vsel %vm252_vm2, %v667_v10, %v896_v0  ;;  %v340_v15 = vsel %vm252_vm2, %v666_v12, %v896_v0  ;;  %s1032_s1 = scalar_lea.hbm %s1083_s4, %s676_s15 }
  0x1c   : > { %701 = vmatprep.subr.mxu0 %v896_v0  ;;  %v217_v5 = vld [vmem:[%s968_s10] sm:$0xff]  ;;  %v318_v17 = vsel %vm252_vm2, %v665_v14, %v896_v0  ;;  %v296_v19 = vsel %vm252_vm2, %v664_v16, %v896_v0  ;;  %v274_v21 = vsel %vm252_vm2, %v663_v18, %v896_v0  ;;  %v662_v22 = vld [vmem:[%s968_s10 + $0x8] sm:$0xff]  ;;  %v253_v23 = vsel %vm252_vm2, %v241_v20, %v896_v0  ;;  %s1034_s23 = scalar_lea.sflag [#allocation18], %s199_s11  ;;  %s787_s25 = scalar_lea.vmem %s1027_s14, 256 }
  0x1d   : > { %702 = vmatpush3.msra.mxu0 %v896_v0  ;;  %v222_v6 = vsel %vm221_vm1, %v217_v5, %v896_v0  ;;  %v232_v24 = vsel %vm221_vm1, %v662_v22, %v896_v0  ;;  %p788_p12 = scmp.ne.s32.totalorder %s1027_s14, %s787_s25  ;;  %s865_s20 = smov [#allocation17]  }
  0x1e   : > { %703 = vmatprep.subr.mxu0 %v896_v0  ;;  %727 = vmatprep.mubr.f32.mxu0 %v222_v6  ;;  %s791_s27 = sshll.u32 %s865_s20, 4  ;;  %s792_s27 = int_to_ptr.vmem [resolvable:$false] %s791_s27 }
  0x1f   : > { %704 = vmatpush3.msra.mxu0 %v896_v0  ;;  %p789_p13 = pnand %p788_p12, %p938_p4  ;;  %s793_s30 = scalar_lea.vmem %s792_s27, 512 }
  0x20   : > { %705 = vmatprep.subr.mxu0 %v896_v0  ;;  %p794_p1 = scmp.lt.s32.totalorder %s1027_s14, %s792_s27  ;;  %p795_p2 = scmp.lt.s32.totalorder %s793_s30, %s787_s25 }
  0x21   : > { %706 = vmatpush3.msra.mxu0 %v896_v0  ;;  %v670_v25 = vld [vmem:[#allocation21] ss:$0 sm:$0xff]  ;;  %p790_p0 = pneg %p789_p13 }
  0x22   : > { %707 = vmatprep.subr.mxu0 %v896_v0  ;;  %p796_p3 = por %p795_p2, %p794_p1 }
  0x23   : > { %708 = vmatpush3.msra.mxu0 %v896_v0 }
  0x24   : > { %709 = vmatprep.subr.mxu0 %v896_v0  ;;  %p797_p5 = pnand %p796_p3, %p790_p0 }
  0x25   : > { %710 = vmatpush3.msra.mxu0 %v896_v0 }
  0x26   : > { %711 = vmatprep.subr.mxu0 %v404_v9 }
  0x27   : > { %712 = vmatpush3.msra.mxu0 %v404_v9 }
  0x28   : > { %713 = vmatprep.subr.mxu0 %v384_v11 }
  0x29   : > { %714 = vmatpush3.msra.mxu0 %v384_v11 }
  0x2a   : > { %715 = vmatprep.subr.mxu0 %v362_v13 }
  0x2b   : > { %716 = vmatpush3.msra.mxu0 %v362_v13 }
  0x2c   : > { %717 = vmatprep.subr.mxu0 %v340_v15 }
  0x2d   : > { %718 = vmatpush3.msra.mxu0 %v340_v15 }
  0x2e   : > { %719 = vmatprep.subr.mxu0 %v318_v17 }
  0x2f   : > { %720 = vmatpush3.msra.mxu0 %v318_v17 }
  0x30   : > { %721 = vmatprep.subr.mxu0 %v296_v19 }
  0x31   : > { %722 = vmatpush3.msra.mxu0 %v296_v19 }
  0x32   : > { %723 = vmatprep.subr.mxu0 %v274_v21 }
  0x33   : > { %724 = vmatpush3.msra.mxu0 %v274_v21 }
  0x34   : > { %725 = vmatprep.subr.mxu0 %v253_v23 }
  0x35   : > { %726 = vmatpush3.msra.mxu0 %v253_v23 }
  0x36   : > { %728 = vmatmul.mubr.f32.vlgmr.msra.gmra.mxu0 %v232_v24 }
  0xf6   : > { %v729_v26 = vpop.f32.mrf.mxu0 }
  0xf7   : > { %v546_v27 = vadd.f32 %v729_v26, %v670_v25 }
  0xf8   : > { %v540_v28 = vpop.f32.mrf.mxu0 }
  0xf9   : > { %550 = vst [vmem:[%s201_s13 + $0x8] sm:$0xff] %v546_v27  ;;  %v541_v29 = vadd.f32 %v670_v25, %v540_v28 }
  0xfb   : > { %549 = vst [vmem:[%s201_s13] sm:$0xff] %v541_v29 }
  0xfc   : > { %800 = shalt.err (!%p797_p5)
}
  0xfd   : > { %s801_s5 = scalar_lea.hbm %s1032_s1, 256  ;;  %s805_s8 = scalar_lea.hbm %s1083_s4, 512 }
  0xfe   : > { %p802_p6 = scmp.ne.s32.totalorder %s1032_s1, %s801_s5  ;;  %p806_p10 = scmp.lt.s32.totalorder %s1032_s1, %s1083_s4 }
  0xff   : > { %p807_p11 = scmp.lt.s32.totalorder %s805_s8, %s801_s5 }
 0x100   : > { %p803_p7 = pnand %p802_p6, %p938_p4 }
 0x101   : > { %p808_p12 = por %p807_p11, %p806_p10 }
 0x102   : > { %p804_p9 = pneg %p803_p7 }
 0x104   : > { %p809_p13 = pnand %p808_p12, %p804_p9 }
 0x106   : > { %812 = shalt.err (!%p809_p13)
}
 0x107   : > { %s866_s12 = smov 128   ;;  %s867_s13 = smov 8  }
 0x108   : > { %730 = dma.vmem_to_hbm [thread:$0]  (%p938_p4), %s1027_s14, 256, %s1032_s1, %s1034_s23, %s866_s12, %s866_s12, %s867_s13  }
 0x109 PF: > { %p736_p0 = scmp.ge.s32.totalorder %s863_s22, 2  ;;  %s581_s15 = sand.u32 1, %s843_s17  }
 0x10a   : > { %s582_s10 = scalar_lea.sflag [#allocation18], %s581_s15 }
 0x10b   : > { %p733_p1 = pnand %p736_p0, %p945_p8 }
 0x10d   : > { %p734_p2 = pneg %p733_p1 }
 0x10f   : > { %838 = dma.done.wait (%p734_p2), %s582_s10, 256  }
 0x110   : > { %840 = vsyncadd (%p734_p2), %s582_s10, 4294967040  ;;  %s20_s22 = sadd.s32 1, %s863_s22   ;;  %s1086_s17 = smov %s847_s18 }
 0x111   : > { %p17_p3 = scmp.ge.s32.totalorder %s20_s22, 4   ;;  %s1087_s18 = smov %s851_s19 }
 0x112   : > { %s1088_s19 = smov %s951_s29  ;;  %s1089_s20 = smov %s859_s21 }
 0x113   : > { %s1090_s21 = smov %s1092_s24  ;;  %19 = sbr.rel (!%p17_p3) target bundleno = 6 (0x6), region = 94 }
 0x118   :  { %587 = vsyncpa [#allocation18], 1 }
 0x119   :  { %589 = vsyncpa [#allocation18 + $0x1], 1 }

</bundles_post_ra>
